<compile_context>
chip_gen: v6e
topology: v6e:2x2x1
jax: 0.10.0
libtpu: 0.0.40
codegen_flags: <defaults>
</compile_context>

<pallas_src>
import jax
import jax.numpy as jnp
from jax.experimental import pallas as pl
from jax.experimental.pallas import tpu as pltpu


# ----------------------------- kernels ------------------------------------ #

def _concat_kernel_dense(*refs):
    """One lane-dense full-width store per tile (inputs concatenated in vregs)."""
    out_ref = refs[-1]
    in_refs = refs[:-1]
    if len(in_refs) == 1:
        out_ref[...] = in_refs[0][...]
    else:
        out_ref[...] = jnp.concatenate([r[...] for r in in_refs], axis=-1)


def _concat_kernel_slicewise(*refs):
    """Per-input store into its (statically known) lane slice of the output.

    Optimal when every feature width is a multiple of 128 (aligned, unmasked
    stores); also serves as a safe fallback for unaligned widths.
    """
    out_ref = refs[-1]
    off = 0
    for r in refs[:-1]:
        d = r.shape[-1]
        out_ref[:, off:off + d] = r[...]
        off += d


# ----------------------------- wrapper ------------------------------------ #

def _build_pallas_concat(kernel, flat_inputs, dims, tb, grid, out_dtype):
    B = flat_inputs[0].shape[0]
    d_total = sum(dims)
    itemsize = jnp.dtype(out_dtype).itemsize

    in_specs = [pl.BlockSpec((tb, d), lambda i: (i, 0)) for d in dims]
    out_spec = pl.BlockSpec((tb, d_total), lambda i: (i, 0))

    return pl.pallas_call(
        kernel,
        out_shape=jax.ShapeDtypeStruct((B, d_total), out_dtype),
        grid=grid,
        in_specs=in_specs,
        out_specs=out_spec,
        compiler_params=pltpu.CompilerParams(
            dimension_semantics=("parallel",),     # batch axis: megacore-shardable
            vmem_limit_bytes=32 * 1024 * 1024,     # explicit budget, fits v7x too
        ),
        cost_estimate=pl.CostEstimate(
            flops=0,
            transcendentals=0,
            bytes_accessed=int(2 * B * d_total * itemsize),
        ),
    )


def concat_last_dim(inputs,
                    *,
                    force_pallas=False,
                    block_rows=None,
                    small_bytes_threshold=1 << 15,
                    vmem_budget_bytes=24 << 20):
    """Concatenate arrays along the last dim (== jnp.concatenate(inputs, -1)).

    Leading dims are flattened to a batch axis which is tiled over the grid.
    """
    assert len(inputs) >= 1
    dtype = inputs[0].dtype
    lead = inputs[0].shape[:-1]
    for x in inputs:
        assert x.dtype == dtype and x.shape[:-1] == lead, "inputs must match on leading dims/dtype"

    dims = [int(x.shape[-1]) for x in inputs]
    d_total = sum(dims)
    out_shape_full = tuple(lead) + (d_total,)
    itemsize = jnp.dtype(dtype).itemsize

    # Degenerate / tiny cases: let XLA fuse the concat (a standalone kernel
    # would force an HBM round trip and launch overhead dominates).
    total_io_bytes = 2 * d_total * itemsize * int(jnp.prod(jnp.array(lead))) if lead else 0
    if len(lead) == 0 or len(inputs) == 1:
        return jnp.concatenate(inputs, axis=-1) if len(inputs) > 1 else inputs[0]
    if (not force_pallas) and total_io_bytes < small_bytes_threshold:
        return jnp.concatenate(inputs, axis=-1)

    # Flatten leading dims to a single batch axis (lane dim stays last).
    B = 1
    for s in lead:
        B *= int(s)
    flat = [x.reshape(B, d) for x, d in zip(inputs, dims)]

    # Batch-tile size: fit (double-buffered) inputs + output in the VMEM budget.
    per_row_bytes = 4 * d_total * itemsize          # 2x(in) + 2x(out) per row
    tb = int(min(vmem_budget_bytes // max(per_row_bytes, 1), 2048))
    if block_rows is not None:
        tb = int(block_rows)
    if tb >= B:
        tb = B                                      # single tile: full-dim block
        grid = (1,)
    else:
        tb = max(8, (tb // 8) * 8)                  # sublane multiple
        grid = (pl.cdiv(B, tb),)

    aligned = all(d % 128 == 0 for d in dims)
    kernels = [_concat_kernel_slicewise] if aligned \
        else [_concat_kernel_dense, _concat_kernel_slicewise]

    last_err = None
    for kern in kernels:
        call = _build_pallas_concat(kern, flat, dims, tb, grid, dtype)
        try:
            out2d = call(*flat)
            return out2d.reshape(out_shape_full)
        except Exception as e:  # e.g. unaligned lane concat unsupported by lowering
            last_err = e
    raise last_err


# ----------------------------- module ------------------------------------- #

class ConcatenationOperationModuleJAX:
    """Minimal JAX analogue of the PyTorch ConcatenationOperationModule."""

    def __init__(self, config=None):
        self.config = dict(config or {"dim": -1, "use_cuda": False, "output_dim": 0})

    def get_reset_states(self, repeat=1):
        return {"output": [jnp.zeros((repeat, self.config["output_dim"]), jnp.float32)]}

    def forward(self, **inputs):
        vals = list(inputs.values())  # dict insertion order == torch.cat order
        dim = self.config.get("dim", -1)
        nd = vals[0].ndim
        axis = dim % nd
        if axis != nd - 1:
            # TODO(synk): non-last-dim concat stays on XLA (no lane-dense Pallas layout win).
            return jnp.concatenate(vals, axis=axis)
        return concat_last_dim(vals)


# ------------------------------ demo --------------------------------------- #

if __name__ == "__main__":
    key = jax.random.PRNGKey(0)
    k1, k2, k3, k4, k5 = jax.random.split(key, 5)

    # Case 1: the module's tiny example shapes (batch=2, features 32/16/48).
    B = 2
    x1 = jax.random.normal(k1, (B, 32), dtype=jnp.float32)
    x2 = jax.random.normal(k2, (B, 16), dtype=jnp.float32)
    x3 = jax.random.normal(k3, (B, 48), dtype=jnp.float32)

    module = ConcatenationOperationModuleJAX(
        config={"dim": -1, "use_cuda": False, "output_dim": 32 + 16 + 48})

    ref_small = jnp.concatenate([x1, x2, x3], axis=-1)

    # Module path: tiny size -> jnp fallback (XLA fuses the concat).
    out_small = jax.block_until_ready(module.forward(input_0=x1, input_1=x2, input_2=x3))
    assert out_small.shape == (B, 96) and out_small.dtype == jnp.float32
    assert jnp.allclose(out_small, ref_small)

    # Forced-Pallas path on the same tiny shapes (exercises the unaligned kernel).
    out_forced = jax.block_until_ready(
        concat_last_dim([x1, x2, x3], force_pallas=True))
    assert jnp.allclose(out_forced, ref_small)

    # Case 2: lane-aligned, batch-tiled path (grid > 1, 128-multiple widths).
    Bt = 256
    a = jax.random.normal(k4, (Bt, 128), dtype=jnp.float32)
    b = jax.random.normal(k5, (Bt, 256), dtype=jnp.float32)
    out_big = jax.block_until_ready(
        concat_last_dim([a, b], force_pallas=True, block_rows=64))
    ref_big = jnp.concatenate([a, b], axis=-1)
    assert out_big.shape == (Bt, 384)
    assert jnp.allclose(out_big, ref_big)

    print("KERNEL_OK")
</pallas_src>

<mosaic_0001>
module attributes {stable_mosaic.version = 11 : i64} {
  func.func @_concat_kernel_dense(%arg0: i32, %arg1: memref<2x32xf32, #tpu.memory_space<vmem>>, %arg2: memref<2x16xf32, #tpu.memory_space<vmem>>, %arg3: memref<2x48xf32, #tpu.memory_space<vmem>>, %arg4: memref<2x96xf32, #tpu.memory_space<vmem>>) attributes {dimension_semantics = [#tpu.dimension_semantics<parallel>], iteration_bounds = array<i64: 1>, scalar_prefetch = 0 : i64, scratch_operands = 0 : i64, tpu.core_type = #tpu.core_type<tc>, window_params = [{transform_indices = @transform_0, window_bounds = array<i64: 2, 32>}, {transform_indices = @transform_1, window_bounds = array<i64: 2, 16>}, {transform_indices = @transform_2, window_bounds = array<i64: 2, 48>}, {transform_indices = @transform_3, window_bounds = array<i64: 2, 96>}]} {
    %c0 = arith.constant 0 : index
    %c0_0 = arith.constant 0 : index
    %0 = vector.load %arg1[%c0, %c0_0] : memref<2x32xf32, #tpu.memory_space<vmem>>, vector<2x32xf32>
    %c0_1 = arith.constant 0 : index
    %c0_2 = arith.constant 0 : index
    %1 = vector.load %arg2[%c0_1, %c0_2] : memref<2x16xf32, #tpu.memory_space<vmem>>, vector<2x16xf32>
    %c0_3 = arith.constant 0 : index
    %c0_4 = arith.constant 0 : index
    %2 = vector.load %arg3[%c0_3, %c0_4] : memref<2x48xf32, #tpu.memory_space<vmem>>, vector<2x48xf32>
    %3 = tpu.concatenate %0, %1, %2 in 1 : vector<2x32xf32>, vector<2x16xf32>, vector<2x48xf32> -> vector<2x96xf32>
    %c0_5 = arith.constant 0 : index
    %c0_6 = arith.constant 0 : index
    %4 = vector.load %arg4[%c0_5, %c0_6] : memref<2x96xf32, #tpu.memory_space<vmem>>, vector<2x96xf32>
    tpu.vector_store %arg4[%c0_5, %c0_6], %3 {strides = array<i32>} : memref<2x96xf32, #tpu.memory_space<vmem>>, vector<2x96xf32>,
    return
  }
  func.func @transform_0(%arg0: i32) -> (i32, i32) {
    %c0_i32 = arith.constant 0 : i32
    %c0_i32_0 = arith.constant 0 : i32
    return %arg0, %c0_i32 : i32, i32
  }
  func.func @transform_1(%arg0: i32) -> (i32, i32) {
    %c0_i32 = arith.constant 0 : i32
    %c0_i32_0 = arith.constant 0 : i32
    return %arg0, %c0_i32 : i32, i32
  }
  func.func @transform_2(%arg0: i32) -> (i32, i32) {
    %c0_i32 = arith.constant 0 : i32
    %c0_i32_0 = arith.constant 0 : i32
    return %arg0, %c0_i32 : i32, i32
  }
  func.func @transform_3(%arg0: i32) -> (i32, i32) {
    %c0_i32 = arith.constant 0 : i32
    %c0_i32_0 = arith.constant 0 : i32
    return %arg0, %c0_i32 : i32, i32
  }
}

module attributes {stable_mosaic.version = 11 : i64} {
  func.func @_concat_kernel_slicewise(%arg0: i32, %arg1: memref<2x32xf32, #tpu.memory_space<vmem>>, %arg2: memref<2x16xf32, #tpu.memory_space<vmem>>, %arg3: memref<2x48xf32, #tpu.memory_space<vmem>>, %arg4: memref<2x96xf32, #tpu.memory_space<vmem>>) attributes {dimension_semantics = [#tpu.dimension_semantics<parallel>], iteration_bounds = array<i64: 1>, scalar_prefetch = 0 : i64, scratch_operands = 0 : i64, tpu.core_type = #tpu.core_type<tc>, window_params = [{transform_indices = @transform_0, window_bounds = array<i64: 2, 32>}, {transform_indices = @transform_1, window_bounds = array<i64: 2, 16>}, {transform_indices = @transform_2, window_bounds = array<i64: 2, 48>}, {transform_indices = @transform_3, window_bounds = array<i64: 2, 96>}]} {
    %c0 = arith.constant 0 : index
    %c0_0 = arith.constant 0 : index
    %0 = vector.load %arg1[%c0, %c0_0] : memref<2x32xf32, #tpu.memory_space<vmem>>, vector<2x32xf32>
    %c0_1 = arith.constant 0 : index
    %c0_2 = arith.constant 0 : index
    %1 = vector.load %arg4[%c0_1, %c0_2] : memref<2x96xf32, #tpu.memory_space<vmem>>, vector<2x32xf32>
    tpu.vector_store %arg4[%c0_1, %c0_2], %0 {strides = array<i32>} : memref<2x96xf32, #tpu.memory_space<vmem>>, vector<2x32xf32>,
    %c0_3 = arith.constant 0 : index
    %c0_4 = arith.constant 0 : index
    %2 = vector.load %arg2[%c0_3, %c0_4] : memref<2x16xf32, #tpu.memory_space<vmem>>, vector<2x16xf32>
    %c0_5 = arith.constant 0 : index
    %c32 = arith.constant 32 : index
    %3 = vector.load %arg4[%c0_5, %c32] : memref<2x96xf32, #tpu.memory_space<vmem>>, vector<2x16xf32>
    tpu.vector_store %arg4[%c0_5, %c32], %2 {strides = array<i32>} : memref<2x96xf32, #tpu.memory_space<vmem>>, vector<2x16xf32>,
    %c0_6 = arith.constant 0 : index
    %c0_7 = arith.constant 0 : index
    %4 = vector.load %arg3[%c0_6, %c0_7] : memref<2x48xf32, #tpu.memory_space<vmem>>, vector<2x48xf32>
    %c0_8 = arith.constant 0 : index
    %c48 = arith.constant 48 : index
    %5 = vector.load %arg4[%c0_8, %c48] : memref<2x96xf32, #tpu.memory_space<vmem>>, vector<2x48xf32>
    tpu.vector_store %arg4[%c0_8, %c48], %4 {strides = array<i32>} : memref<2x96xf32, #tpu.memory_space<vmem>>, vector<2x48xf32>,
    return
  }
  func.func @transform_0(%arg0: i32) -> (i32, i32) {
    %c0_i32 = arith.constant 0 : i32
    %c0_i32_0 = arith.constant 0 : i32
    return %arg0, %c0_i32 : i32, i32
  }
  func.func @transform_1(%arg0: i32) -> (i32, i32) {
    %c0_i32 = arith.constant 0 : i32
    %c0_i32_0 = arith.constant 0 : i32
    return %arg0, %c0_i32 : i32, i32
  }
  func.func @transform_2(%arg0: i32) -> (i32, i32) {
    %c0_i32 = arith.constant 0 : i32
    %c0_i32_0 = arith.constant 0 : i32
    return %arg0, %c0_i32 : i32, i32
  }
  func.func @transform_3(%arg0: i32) -> (i32, i32) {
    %c0_i32 = arith.constant 0 : i32
    %c0_i32_0 = arith.constant 0 : i32
    return %arg0, %c0_i32 : i32, i32
  }
}

</mosaic_0001>

<bundles_post_ra>
// kernel: tpu_custom_call.1
= control target key start
LH: loop header
LB: loop body
LE: loop exit
PB: predicated region body
PF: predicated region fallthrough
CT: control target
= control target key end

     0   :  { %8 = vsyncpa [#allocation3], 0  ;;  %s180_s0 = inlined_call_operand.hbm [shape: f32[2,32], index: 0, kind: input, shape index: {}]   ;;  %s181_s1 = inlined_call_operand.hbm [shape: f32[2,16], index: 1, kind: input, shape index: {}]   ;;  %s182_s2 = inlined_call_operand.vmem [shape: f32[2,48], index: 2, kind: input, shape index: {}]   ;;  %s183_s3 = inlined_call_operand.hbm [shape: f32[2,96], index: 3, kind: output, shape index: {}]  }
   0x1   :  { %9 = vsyncpa [#allocation6], 0 }
   0x2   :  { %10 = vsyncpa [#allocation4], 0  ;;  %s143_s12 = smov [#allocation2]   ;;  %s144_s14 = smov [#allocation5]  }
   0x3   :  { %s17_s13 = sshll.u32 %s143_s12, 4  ;;  %s27_s15 = sshll.u32 %s144_s14, 4  ;;  %s18_s13 = int_to_ptr.vmem [resolvable:$true] %s17_s13  ;;  %s28_s15 = int_to_ptr.vmem [resolvable:$true] %s27_s15 }
   0x4   :  { %s85_s16 = scalar_lea.vmem %s18_s13, 32  ;;  %p90_p1 = scmp.lt.s32.totalorder %s18_s13, %s18_s13 }
   0x5   :  { %p86_p0 = scmp.ne.s32.totalorder %s18_s13, %s85_s16  ;;  %p91_p2 = scmp.lt.s32.totalorder %s85_s16, %s85_s16 }
   0x7   :  { %p92_p3 = por %p91_p2, %p90_p1 }
   0x9   :  { %p93_p4 = pnand %p92_p3, %p86_p0 }
   0xb   :  { %96 = shalt.err (!%p93_p4)
}
   0xc   :  { %20 = dma.hbm_to_vmem [thread:$0]  %s180_s0, 32, %s18_s13, [#allocation3]  }
   0xd   :  { %s105_s19 = scalar_lea.vmem %s28_s15, 32  ;;  %p110_p6 = scmp.lt.s32.totalorder %s28_s15, %s28_s15 }
   0xe   :  { %p106_p5 = scmp.ne.s32.totalorder %s28_s15, %s105_s19  ;;  %p111_p7 = scmp.lt.s32.totalorder %s105_s19, %s105_s19 }
  0x10   :  { %p112_p8 = por %p111_p7, %p110_p6 }
  0x12   :  { %p113_p9 = pnand %p112_p8, %p106_p5 }
  0x14   :  { %116 = shalt.err (!%p113_p9)
}
  0x15   :  { %30 = dma.hbm_to_vmem [thread:$0]  %s181_s1, 32, %s28_s15, [#allocation6]  }
  0x16   :  { %137 = dma.done.wait [#allocation3], 32  }
  0x17   :  { %138 = vsyncadd [#allocation3], 4294967264 }
  0x18   :  { %139 = dma.done.wait [#allocation6], 32  }
  0x19   :  { %140 = vsyncadd [#allocation6], 4294967264  ;;  %v40_v0 = vld [vmem:[#allocation5] sm:$0x3]  ;;  %s145_s22 = smov 32   ;;  %s146_s24 = smov 48  }
  0x1a   :  { %43 = vrot.lane.b32.xlu0 %v40_v0, %s145_s22  ;;  %v41_v1 = vld [vmem:[%s182_s2] sm:$0x3]  ;;  %vm50_vm0 = vcmask 261120   ;;  %s147_s25 = smov [#allocation7]   ;;  %vm52_vm1 = vcmask 392192   ;;  %vm54_vm2 = vcmask 779264  }
  0x1b   :  { %v39_v3 = vld [vmem:[#allocation2] sm:$0x3]  ;;  %s62_s26 = sshll.u32 %s147_s25, 4  ;;  %s63_s26 = int_to_ptr.vmem [resolvable:$true] %s62_s26 }
  0x1c   :  { %s117_s1 = scalar_lea.vmem %s63_s26, 32  ;;  %p122_p11 = scmp.lt.s32.totalorder %s63_s26, %s63_s26 }
  0x1d   :  { %p118_p10 = scmp.ne.s32.totalorder %s63_s26, %s117_s1  ;;  %p123_p12 = scmp.lt.s32.totalorder %s117_s1, %s117_s1 }
  0x1e   :  { %47 = vrot.lane.b32.xlu0 %v41_v1, %s146_s24 }
  0x1f   :  { %p124_p13 = por %p123_p12, %p122_p11 }
  0x21   :  { %p125_p0 = pnand %p124_p13, %p118_p10 }
  0x8c   :  { %v44_v2 = vpop.permute.xlu0 %43 }
  0x8d   :  { %v51_v4 = vsel %vm50_vm0, %v39_v3, %v44_v2 }
  0x90   :  { %v48_v5 = vpop.permute.xlu0 %47 }
  0x91   :  { %v53_v6 = vsel %vm52_vm1, %v51_v4, %v48_v5 }
  0x92   :  { %55 = vst.msk [vmem:[#allocation7] sm:$0x3] %vm54_vm2, %v53_v6 }
  0x93   :  { %128 = shalt.err (!%p125_p0)
}
  0x94   :  { %65 = dma.vmem_to_hbm [thread:$0]  %s63_s26, 32, %s183_s3, [#allocation4]  }
  0x95   :  { %141 = dma.done.wait [#allocation4], 32  }
  0x96   :  { %142 = vsyncadd [#allocation4], 4294967264 }
  0x97   :  { %69 = vsyncpa [#allocation3], 1 }
  0x98   :  { %70 = vsyncpa [#allocation6], 1 }
  0x99   :  { %71 = vsyncpa [#allocation4], 1 }

// kernel: tpu_custom_call.1
= control target key start
LH: loop header
LB: loop body
LE: loop exit
PB: predicated region body
PF: predicated region fallthrough
CT: control target
= control target key end

     0   :  { %8 = vsyncpa [#allocation3], 0  ;;  %s180_s0 = inlined_call_operand.hbm [shape: f32[2,32], index: 0, kind: input, shape index: {}]   ;;  %s181_s1 = inlined_call_operand.hbm [shape: f32[2,16], index: 1, kind: input, shape index: {}]   ;;  %s182_s2 = inlined_call_operand.vmem [shape: f32[2,48], index: 2, kind: input, shape index: {}]   ;;  %s183_s3 = inlined_call_operand.hbm [shape: f32[2,96], index: 3, kind: output, shape index: {}]  }
   0x1   :  { %9 = vsyncpa [#allocation6], 0 }
   0x2   :  { %10 = vsyncpa [#allocation4], 0  ;;  %s143_s12 = smov [#allocation2]   ;;  %s144_s14 = smov [#allocation5]  }
   0x3   :  { %s17_s13 = sshll.u32 %s143_s12, 4  ;;  %s27_s15 = sshll.u32 %s144_s14, 4  ;;  %s18_s13 = int_to_ptr.vmem [resolvable:$true] %s17_s13  ;;  %s28_s15 = int_to_ptr.vmem [resolvable:$true] %s27_s15 }
   0x4   :  { %s85_s16 = scalar_lea.vmem %s18_s13, 32  ;;  %p90_p1 = scmp.lt.s32.totalorder %s18_s13, %s18_s13 }
   0x5   :  { %p86_p0 = scmp.ne.s32.totalorder %s18_s13, %s85_s16  ;;  %p91_p2 = scmp.lt.s32.totalorder %s85_s16, %s85_s16 }
   0x7   :  { %p92_p3 = por %p91_p2, %p90_p1 }
   0x9   :  { %p93_p4 = pnand %p92_p3, %p86_p0 }
   0xb   :  { %96 = shalt.err (!%p93_p4)
}
   0xc   :  { %20 = dma.hbm_to_vmem [thread:$0]  %s180_s0, 32, %s18_s13, [#allocation3]  }
   0xd   :  { %s105_s19 = scalar_lea.vmem %s28_s15, 32  ;;  %p110_p6 = scmp.lt.s32.totalorder %s28_s15, %s28_s15 }
   0xe   :  { %p106_p5 = scmp.ne.s32.totalorder %s28_s15, %s105_s19  ;;  %p111_p7 = scmp.lt.s32.totalorder %s105_s19, %s105_s19 }
  0x10   :  { %p112_p8 = por %p111_p7, %p110_p6 }
  0x12   :  { %p113_p9 = pnand %p112_p8, %p106_p5 }
  0x14   :  { %116 = shalt.err (!%p113_p9)
}
  0x15   :  { %30 = dma.hbm_to_vmem [thread:$0]  %s181_s1, 32, %s28_s15, [#allocation6]  }
  0x16   :  { %137 = dma.done.wait [#allocation3], 32  }
  0x17   :  { %138 = vsyncadd [#allocation3], 4294967264 }
  0x18   :  { %139 = dma.done.wait [#allocation6], 32  }
  0x19   :  { %140 = vsyncadd [#allocation6], 4294967264  ;;  %vm40_vm0 = vcmask 254976   ;;  %v42_v0 = vld [vmem:[#allocation5] sm:$0x3]  ;;  %s145_s22 = smov 32  }
  0x1a   :  { %v39_v1 = vld [vmem:[#allocation2] sm:$0x3]  ;;  %44 = vrot.lane.b32.xlu0 %v42_v0, %s145_s22  ;;  %s146_s24 = smov 48   ;;  %vm47_vm1 = vcmask 386304   ;;  %s147_s25 = smov [#allocation7]   ;;  %vm54_vm2 = vcmask 779648  }
  0x1b   :  { %41 = vst.msk [vmem:[#allocation7] sm:$0x3] %vm40_vm0, %v39_v1  ;;  %v49_v2 = vld [vmem:[%s182_s2] sm:$0x3]  ;;  %s62_s1 = sshll.u32 %s147_s25, 4  ;;  %s63_s1 = int_to_ptr.vmem [resolvable:$true] %s62_s1 }
  0x1c   :  { %s117_s26 = scalar_lea.vmem %s63_s1, 32  ;;  %p122_p11 = scmp.lt.s32.totalorder %s63_s1, %s63_s1 }
  0x1d   :  { %p118_p10 = scmp.ne.s32.totalorder %s63_s1, %s117_s26  ;;  %p123_p12 = scmp.lt.s32.totalorder %s117_s26, %s117_s26 }
  0x1e   :  { %51 = vrot.lane.b32.xlu0 %v49_v2, %s146_s24 }
  0x1f   :  { %p124_p13 = por %p123_p12, %p122_p11 }
  0x21   :  { %p125_p0 = pnand %p124_p13, %p118_p10 }
  0x8c   :  { %v45_v3 = vpop.permute.xlu0 %44 }
  0x8d   :  { %48 = vst.msk [vmem:[#allocation7] sm:$0x3] %vm47_vm1, %v45_v3 }
  0x90   :  { %v52_v4 = vpop.permute.xlu0 %51 }
  0x91   :  { %55 = vst.msk [vmem:[#allocation7] sm:$0x3] %vm54_vm2, %v52_v4 }
  0x92   :  { %128 = shalt.err (!%p125_p0)
}
  0x93   :  { %65 = dma.vmem_to_hbm [thread:$0]  %s63_s1, 32, %s183_s3, [#allocation4]  }
  0x94   :  { %141 = dma.done.wait [#allocation4], 32  }
  0x95   :  { %142 = vsyncadd [#allocation4], 4294967264 }
  0x96   :  { %69 = vsyncpa [#allocation3], 1 }
  0x97   :  { %70 = vsyncpa [#allocation6], 1 }
  0x98   :  { %71 = vsyncpa [#allocation4], 1 }

</bundles_post_ra>
